<compile_context>
chip_gen: v6e
topology: v6e:2x2x1
jax: 0.10.0
libtpu: 0.0.40
codegen_flags: <defaults>
</compile_context>

<pallas_src>
import functools

import jax
import jax.numpy as jnp
from jax import lax
from jax.experimental import pallas as pl
from jax.experimental.pallas import tpu as pltpu

EPS = 1e-5


def _bn_relu(a, gamma, beta, *, fold, channels, count):
    """Training-mode BatchNorm1d + ReLU on the lane-dense folded 2D view.

    a: (rows, fold*channels) f32 (padded rows must already be zero).
    gamma, beta: (1, channels) f32.
    """
    rows = a.shape[0]
    fc = fold * channels
    ones = jnp.ones((1, rows), jnp.float32)
    # Single MXU push: sum and sum-of-squares together (f32 for stats accuracy).
    stacked = jnp.concatenate([a, a * a], axis=-1)                      # (rows, 2*FC)
    sums = jnp.dot(ones, stacked, preferred_element_type=jnp.float32)   # (1, 2*FC)
    s_fc, ss_fc = sums[:, :fc], sums[:, fc:]
    # Collapse the F fold positions down to per-channel sums (1, C).
    s_c = s_fc[:, :channels]
    ss_c = ss_fc[:, :channels]
    for p in range(1, fold):
        s_c = s_c + s_fc[:, p * channels:(p + 1) * channels]
        ss_c = ss_c + ss_fc[:, p * channels:(p + 1) * channels]
    inv_count = 1.0 / count
    mean = s_c * inv_count
    # TODO(synk): single-pass E[x^2]-E[x]^2 can cancel at production scales with
    # large |mean|; switch to a shifted/two-pass form for huge N*L.
    var = jnp.maximum(ss_c * inv_count - mean * mean, 0.0)   # biased variance
    scale = gamma * lax.rsqrt(var + EPS)
    shift = beta - mean * scale
    scale_fc = jnp.concatenate([scale] * fold, axis=-1)       # (1, FC)
    shift_fc = jnp.concatenate([shift] * fold, axis=-1)
    # One fused mul+add pass + ReLU over full 128-lane vregs.
    return jnp.maximum(a * scale_fc + shift_fc, 0.0)


def residual_block_kernel(
    x_ref, rin_ref, vmask_ref,
    g1_ref, b1_ref, w1_ref, c1_ref,
    g2_ref, b2_ref, w2_ref, c2_ref,
    out_ref,
    *, offsets, fold, channels, lb, count, apply_mask,
):
    rows, fc = x_ref.shape
    x = x_ref[...]

    # Per-offset batch-boundary masks, hoisted once and shared by both convs.
    # Output row r may only accumulate offset b if source row r+b is in the
    # same batch; out-of-batch rows are exactly the conv's zero-padding region.
    rin = rin_ref[...]                                    # (rows, 1) f32 row-in-batch
    bmask = {}
    for b in offsets:
        if b == 0:
            continue
        src = rin + float(b)
        bmask[b] = jnp.where((src >= 0.0) & (src <= float(lb - 1)), 1.0, 0.0)

    vmask = vmask_ref[...] if apply_mask else None        # (rows, FC) validity mask

    def conv(a, w_ref, bias, base):
        # One wide bf16 MXU push per layer: (rows, FC) x (FC, n_off*FC),
        # f32 accumulation.  Lane slices at multiples of FC are vreg-aligned.
        a16 = a.astype(jnp.bfloat16)
        wide = jnp.dot(a16, w_ref[...], preferred_element_type=jnp.float32)
        acc = base + bias
        for i, b in enumerate(offsets):
            contrib = wide[:, i * fc:(i + 1) * fc]
            if b == 0:
                acc = acc + contrib
            else:
                # acc[r] += contrib[r + b]; the roll rides the XLU slot and the
                # masked accumulate is full-width unmasked VPU work.
                acc = acc + pltpu.roll(contrib, (-b) % rows, axis=0) * bmask[b]
        return acc

    h = _bn_relu(x, g1_ref[...], b1_ref[...], fold=fold, channels=channels, count=count)
    if apply_mask:
        h = h * vmask
    h = conv(h, w1_ref, c1_ref[...], 0.0)
    if apply_mask:
        h = h * vmask
    h = _bn_relu(h, g2_ref[...], b2_ref[...], fold=fold, channels=channels, count=count)
    if apply_mask:
        h = h * vmask
    # conv2 accumulates bias + residual (x) directly into the output value:
    # exactly one full-tensor store, no accumulator scratch.
    out_ref[...] = conv(h, w2_ref, c2_ref[...], x).astype(out_ref.dtype)


def _fold_conv_weight(w_kio, *, channels, fold, dilation, padding):
    """Fold (K, C_in, C_out) tap weights into a lane-concatenated bf16 weight.

    For output position i = fold*j + p, tap k reads input i + k*dilation - P
    = fold*(j + b) + p'.  Block W_b[p'*C + ci, p*C + co] accumulates
    w[k, ci, co]; blocks are concatenated along output lanes in offset order.
    """
    k_taps = w_kio.shape[0]
    fc = fold * channels
    blocks = {}
    for k in range(k_taps):
        off = k * dilation - padding
        for p in range(fold):
            q = p + off
            b, pp = q // fold, q % fold
            if b not in blocks:
                blocks[b] = jnp.zeros((fc, fc), jnp.float32)
            blocks[b] = blocks[b].at[pp * channels:(pp + 1) * channels,
                                     p * channels:(p + 1) * channels].add(
                                         w_kio[k].astype(jnp.float32))
    if 0 not in blocks:
        blocks[0] = jnp.zeros((fc, fc), jnp.float32)
    offsets = tuple(sorted(blocks))
    wcat = jnp.concatenate([blocks[b] for b in offsets], axis=1).astype(jnp.bfloat16)
    return offsets, wcat


def residual_block(x_nlc, params, *, kernel_size, dilation):
    n, length, channels = x_nlc.shape
    padding = (kernel_size - 1) // 2 * dilation
    g1, b1, w1, c1, g2, b2, w2, c2 = params

    # Lane-dense fold factor: pack `fold` consecutive length positions into
    # the lane dim so the minor dim is 128.
    if channels <= 128 and 128 % channels == 0:
        fold = 128 // channels
    else:
        fold = 1  # TODO(synk): channel-pad to a divisor of 128 for full lane use.

    # Pad length so lb (folded rows per batch) is a multiple of 8; padded
    # positions stay zero and are masked out of BN stats / conv inputs inside
    # the kernel (the BN divisor uses the true N*L).
    unit = 8 * fold
    l_pad = -(-length // unit) * unit
    pad = l_pad - length
    lb = l_pad // fold
    rows = n * lb
    fc = fold * channels

    off1, wcat1 = _fold_conv_weight(w1, channels=channels, fold=fold,
                                    dilation=dilation, padding=padding)
    off2, wcat2 = _fold_conv_weight(w2, channels=channels, fold=fold,
                                    dilation=dilation, padding=padding)
    assert off1 == off2
    offsets = off1

    x_p = jnp.pad(x_nlc, ((0, 0), (0, pad), (0, 0))) if pad else x_nlc
    x_fold = x_p.astype(jnp.float32).reshape(rows, fc)

    # Row-in-batch index for the per-offset batch-boundary masks.
    rin = jnp.tile(jnp.arange(lb, dtype=jnp.float32), n).reshape(rows, 1)

    # Valid-position mask (1 = real position, 0 = padding) in the folded layout.
    if pad:
        pos_valid = (jnp.arange(l_pad) < length).astype(jnp.float32)        # (L_pad,)
        vmask = jnp.repeat(pos_valid.reshape(lb, fold), channels, axis=1)   # (lb, FC)
        vmask = jnp.tile(vmask, (n, 1))                                     # (rows, FC)
    else:
        vmask = jnp.ones((rows, fc), jnp.float32)   # never read (apply_mask=False)
    # TODO(synk): at production SpliceAI sizes split into a streaming stats
    # pass + halo-tiled BN-apply/conv/residual pass with a "parallel" grid
    # (2 TCs on v7x, DMA/compute overlap); BN stats are global over (N, L), so
    # naive per-tile tiling would change semantics.

    gamma1 = g1.reshape(1, channels).astype(jnp.float32)
    beta1 = b1.reshape(1, channels).astype(jnp.float32)
    gamma2 = g2.reshape(1, channels).astype(jnp.float32)
    beta2 = b2.reshape(1, channels).astype(jnp.float32)
    bias1 = jnp.tile(c1, fold).reshape(1, fc).astype(jnp.float32)
    bias2 = jnp.tile(c2, fold).reshape(1, fc).astype(jnp.float32)

    kernel = functools.partial(
        residual_block_kernel, offsets=offsets, fold=fold, channels=channels,
        lb=lb, count=float(n * length), apply_mask=bool(pad))

    # Generation-aware VMEM budget derived from the resident footprint
    # (single block, no double-buffering overhead).
    copy_bytes = rows * fc * 4
    need = copy_bytes * (8 + 2 * len(offsets)) + 2 * int(wcat1.size) * 2 + (2 << 20)
    try:
        cap = int(pltpu.get_tpu_info().vmem_capacity_bytes)
    except Exception:
        cap = 64 << 20   # v7x-safe fallback
    vmem_limit = int(min(max(need, 16 << 20), int(0.9 * cap)))

    vmem = pl.BlockSpec(memory_space=pltpu.MemorySpace.VMEM)
    out_fold = pl.pallas_call(
        kernel,
        out_shape=jax.ShapeDtypeStruct((rows, fc), jnp.float32),
        in_specs=[vmem] * 11,
        out_specs=vmem,
        compiler_params=pltpu.CompilerParams(vmem_limit_bytes=vmem_limit),
    )(x_fold, rin, vmask, gamma1, beta1, wcat1, bias1, gamma2, beta2, wcat2, bias2)

    out = out_fold.reshape(n, l_pad, channels).astype(x_nlc.dtype)
    return out[:, :length, :] if pad else out


def residual_block_reference(x_nlc, params, *, kernel_size, dilation):
    # Pure-JAX reference (lax conv) for correctness checking.
    P = (kernel_size - 1) // 2 * dilation
    g1, b1, w1, c1, g2, b2, w2, c2 = params

    def bn_relu(h, gamma, beta):
        mean = jnp.mean(h, axis=(0, 1), keepdims=True)
        var = jnp.mean((h - mean) ** 2, axis=(0, 1), keepdims=True)
        out = (h - mean) * lax.rsqrt(var + EPS) * gamma[None, None, :] + beta[None, None, :]
        return jnp.maximum(out, 0.0)

    def conv(h, w, c):
        # w: (K, C_in, C_out) == 'WIO'
        y = lax.conv_general_dilated(
            h, w, window_strides=(1,), padding=[(P, P)],
            rhs_dilation=(dilation,),
            dimension_numbers=("NWC", "WIO", "NWC"))
        return y + c[None, None, :]

    h = bn_relu(x_nlc, g1, b1)
    h = conv(h, w1, c1)
    h = bn_relu(h, g2, b2)
    h = conv(h, w2, c2)
    return x_nlc + h


def _make_case(key, n, c, l, kernel_size):
    kx, k1, k2, k3, k4, k5, k6, k7, k8 = jax.random.split(key, 9)
    x_ncl = jax.random.normal(kx, (n, c, l), dtype=jnp.float32)        # PyTorch NCL
    g1 = 1.0 + 0.1 * jax.random.normal(k1, (c,), dtype=jnp.float32)
    b1 = 0.1 * jax.random.normal(k2, (c,), dtype=jnp.float32)
    g2 = 1.0 + 0.1 * jax.random.normal(k3, (c,), dtype=jnp.float32)
    b2 = 0.1 * jax.random.normal(k4, (c,), dtype=jnp.float32)
    # Conv1d weights: PyTorch (C_out, C_in, K) -> kernel layout (K, C_in, C_out)
    w1_t = 0.1 * jax.random.normal(k5, (c, c, kernel_size), dtype=jnp.float32)
    w2_t = 0.1 * jax.random.normal(k6, (c, c, kernel_size), dtype=jnp.float32)
    w1 = jnp.transpose(w1_t, (2, 1, 0))
    w2 = jnp.transpose(w2_t, (2, 1, 0))
    c1 = 0.05 * jax.random.normal(k7, (c,), dtype=jnp.float32)
    c2 = 0.05 * jax.random.normal(k8, (c,), dtype=jnp.float32)
    return x_ncl, (g1, b1, w1, c1, g2, b2, w2, c2)


if __name__ == "__main__":
    # SpliceAI-like config: channels=32, kernel_size=3, dilation=2.
    kernel_size, dilation = 3, 2
    key = jax.random.PRNGKey(0)
    k_a, k_b = jax.random.split(key)

    # Case 1: shapes that fold exactly (C=32 -> fold=4, L % 32 == 0).
    x_ncl, params = _make_case(k_a, 2, 32, 64, kernel_size)
    x_nlc = jnp.transpose(x_ncl, (0, 2, 1))                            # NCL -> NLC
    out_nlc = jax.block_until_ready(
        residual_block(x_nlc, params, kernel_size=kernel_size, dilation=dilation))
    ref_nlc = residual_block_reference(
        x_nlc, params, kernel_size=kernel_size, dilation=dilation)
    out_ncl = jnp.transpose(out_nlc, (0, 2, 1))                        # back to NCL
    assert out_ncl.shape == x_ncl.shape
    assert jnp.allclose(out_nlc, ref_nlc, atol=3e-2, rtol=3e-2), \
        float(jnp.max(jnp.abs(out_nlc - ref_nlc)))

    # Case 2: length that needs padding (L=50), exercising the masked path.
    x_ncl2, params2 = _make_case(k_b, 2, 32, 50, kernel_size)
    x_nlc2 = jnp.transpose(x_ncl2, (0, 2, 1))
    out_nlc2 = jax.block_until_ready(
        residual_block(x_nlc2, params2, kernel_size=kernel_size, dilation=dilation))
    ref_nlc2 = residual_block_reference(
        x_nlc2, params2, kernel_size=kernel_size, dilation=dilation)
    assert out_nlc2.shape == x_nlc2.shape
    assert jnp.allclose(out_nlc2, ref_nlc2, atol=3e-2, rtol=3e-2), \
        float(jnp.max(jnp.abs(out_nlc2 - ref_nlc2)))

    print("KERNEL_OK")
</pallas_src>

<mosaic_0001>
module attributes {stable_mosaic.version = 11 : i64} {
  func.func @residual_block_kernel(%arg0: memref<32x128xf32, #tpu.memory_space<vmem>>, %arg1: memref<32x1xf32, #tpu.memory_space<vmem>>, %arg2: memref<32x128xf32, #tpu.memory_space<vmem>>, %arg3: memref<1x32xf32, #tpu.memory_space<vmem>>, %arg4: memref<1x32xf32, #tpu.memory_space<vmem>>, %arg5: memref<128x384xbf16, #tpu.memory_space<vmem>>, %arg6: memref<1x128xf32, #tpu.memory_space<vmem>>, %arg7: memref<1x32xf32, #tpu.memory_space<vmem>>, %arg8: memref<1x32xf32, #tpu.memory_space<vmem>>, %arg9: memref<128x384xbf16, #tpu.memory_space<vmem>>, %arg10: memref<1x128xf32, #tpu.memory_space<vmem>>, %arg11: memref<32x128xf32, #tpu.memory_space<vmem>>) attributes {dimension_semantics = [], scalar_prefetch = 0 : i64, scratch_operands = 0 : i64, tpu.core_type = #tpu.core_type<tc>} {
    %c0 = arith.constant 0 : index
    %c0_0 = arith.constant 0 : index
    %0 = vector.load %arg0[%c0, %c0_0] : memref<32x128xf32, #tpu.memory_space<vmem>>, vector<32x128xf32>
    %c0_1 = arith.constant 0 : index
    %c0_2 = arith.constant 0 : index
    %1 = vector.load %arg1[%c0_1, %c0_2] : memref<32x1xf32, #tpu.memory_space<vmem>>, vector<32x1xf32>
    %cst = arith.constant -1.000000e+00 : f32
    %2 = vector.broadcast %cst : f32 to vector<32x1xf32>
    %3 = arith.addf %1, %2 : vector<32x1xf32>
    %cst_3 = arith.constant 0.000000e+00 : f32
    %4 = vector.broadcast %cst_3 : f32 to vector<32x1xf32>
    %5 = arith.cmpf oge, %3, %4 : vector<32x1xf32>
    %cst_4 = arith.constant 1.500000e+01 : f32
    %6 = vector.broadcast %cst_4 : f32 to vector<32x1xf32>
    %7 = arith.cmpf ole, %3, %6 : vector<32x1xf32>
    %8 = arith.andi %5, %7 : vector<32x1xi1>
    %cst_5 = arith.constant 1.000000e+00 : f32
    %cst_6 = arith.constant 0.000000e+00 : f32
    %9 = vector.broadcast %cst_5 : f32 to vector<32x1xf32>
    %10 = vector.broadcast %cst_6 : f32 to vector<32x1xf32>
    %11 = arith.select %8, %9, %10 : vector<32x1xi1>, vector<32x1xf32>
    %cst_7 = arith.constant 1.000000e+00 : f32
    %12 = vector.broadcast %cst_7 : f32 to vector<32x1xf32>
    %13 = arith.addf %1, %12 : vector<32x1xf32>
    %cst_8 = arith.constant 0.000000e+00 : f32
    %14 = vector.broadcast %cst_8 : f32 to vector<32x1xf32>
    %15 = arith.cmpf oge, %13, %14 : vector<32x1xf32>
    %cst_9 = arith.constant 1.500000e+01 : f32
    %16 = vector.broadcast %cst_9 : f32 to vector<32x1xf32>
    %17 = arith.cmpf ole, %13, %16 : vector<32x1xf32>
    %18 = arith.andi %15, %17 : vector<32x1xi1>
    %cst_10 = arith.constant 1.000000e+00 : f32
    %cst_11 = arith.constant 0.000000e+00 : f32
    %19 = vector.broadcast %cst_10 : f32 to vector<32x1xf32>
    %20 = vector.broadcast %cst_11 : f32 to vector<32x1xf32>
    %21 = arith.select %18, %19, %20 : vector<32x1xi1>, vector<32x1xf32>
    %c0_12 = arith.constant 0 : index
    %c0_13 = arith.constant 0 : index
    %22 = vector.load %arg3[%c0_12, %c0_13] : memref<1x32xf32, #tpu.memory_space<vmem>>, vector<1x32xf32>
    %c0_14 = arith.constant 0 : index
    %c0_15 = arith.constant 0 : index
    %23 = vector.load %arg4[%c0_14, %c0_15] : memref<1x32xf32, #tpu.memory_space<vmem>>, vector<1x32xf32>
    %cst_16 = arith.constant 1.000000e+00 : f32
    %24 = vector.broadcast %cst_16 : f32 to vector<1x32xf32>
    %25 = arith.mulf %0, %0 : vector<32x128xf32>
    %26 = tpu.concatenate %0, %25 in 1 : vector<32x128xf32>, vector<32x128xf32> -> vector<32x256xf32>
    %cst_17 = arith.constant dense<0.000000e+00> : vector<1x256xf32>
    %27 = tpu.matmul %24, %26, %cst_17 {dimension_numbers = #tpu.dot_dimension_numbers<[1], [0], [0], [1], [0, 0, 1, 1], [], []>} : vector<1x32xf32>, vector<32x256xf32>, vector<1x256xf32> -> vector<1x256xf32>
    %28 = vector.extract_strided_slice %27 {offsets = [0, 0], sizes = [1, 128], strides = [1, 1]} : vector<1x256xf32> to vector<1x128xf32>
    %29 = vector.extract_strided_slice %27 {offsets = [0, 128], sizes = [1, 128], strides = [1, 1]} : vector<1x256xf32> to vector<1x128xf32>
    %30 = vector.extract_strided_slice %28 {offsets = [0, 0], sizes = [1, 32], strides = [1, 1]} : vector<1x128xf32> to vector<1x32xf32>
    %31 = vector.extract_strided_slice %29 {offsets = [0, 0], sizes = [1, 32], strides = [1, 1]} : vector<1x128xf32> to vector<1x32xf32>
    %32 = vector.extract_strided_slice %28 {offsets = [0, 32], sizes = [1, 32], strides = [1, 1]} : vector<1x128xf32> to vector<1x32xf32>
    %33 = arith.addf %30, %32 : vector<1x32xf32>
    %34 = vector.extract_strided_slice %29 {offsets = [0, 32], sizes = [1, 32], strides = [1, 1]} : vector<1x128xf32> to vector<1x32xf32>
    %35 = arith.addf %31, %34 : vector<1x32xf32>
    %36 = vector.extract_strided_slice %28 {offsets = [0, 64], sizes = [1, 32], strides = [1, 1]} : vector<1x128xf32> to vector<1x32xf32>
    %37 = arith.addf %33, %36 : vector<1x32xf32>
    %38 = vector.extract_strided_slice %29 {offsets = [0, 64], sizes = [1, 32], strides = [1, 1]} : vector<1x128xf32> to vector<1x32xf32>
    %39 = arith.addf %35, %38 : vector<1x32xf32>
    %40 = vector.extract_strided_slice %28 {offsets = [0, 96], sizes = [1, 32], strides = [1, 1]} : vector<1x128xf32> to vector<1x32xf32>
    %41 = arith.addf %37, %40 : vector<1x32xf32>
    %42 = vector.extract_strided_slice %29 {offsets = [0, 96], sizes = [1, 32], strides = [1, 1]} : vector<1x128xf32> to vector<1x32xf32>
    %43 = arith.addf %39, %42 : vector<1x32xf32>
    %cst_18 = arith.constant 7.812500e-03 : f32
    %44 = vector.broadcast %cst_18 : f32 to vector<1x32xf32>
    %45 = arith.mulf %41, %44 : vector<1x32xf32>
    %cst_19 = arith.constant 7.812500e-03 : f32
    %46 = vector.broadcast %cst_19 : f32 to vector<1x32xf32>
    %47 = arith.mulf %43, %46 : vector<1x32xf32>
    %48 = arith.mulf %45, %45 : vector<1x32xf32>
    %49 = arith.subf %47, %48 : vector<1x32xf32>
    %cst_20 = arith.constant 0.000000e+00 : f32
    %50 = vector.broadcast %cst_20 : f32 to vector<1x32xf32>
    %51 = arith.maximumf %49, %50 : vector<1x32xf32>
    %cst_21 = arith.constant 9.99999974E-6 : f32
    %52 = vector.broadcast %cst_21 : f32 to vector<1x32xf32>
    %53 = arith.addf %51, %52 : vector<1x32xf32>
    %54 = math.rsqrt %53 : vector<1x32xf32>
    %55 = arith.mulf %22, %54 : vector<1x32xf32>
    %56 = arith.mulf %45, %55 : vector<1x32xf32>
    %57 = arith.subf %23, %56 : vector<1x32xf32>
    %58 = tpu.concatenate %55, %55, %55, %55 in 1 : vector<1x32xf32>, vector<1x32xf32>, vector<1x32xf32>, vector<1x32xf32> -> vector<1x128xf32>
    %59 = tpu.concatenate %57, %57, %57, %57 in 1 : vector<1x32xf32>, vector<1x32xf32>, vector<1x32xf32>, vector<1x32xf32> -> vector<1x128xf32>
    %60 = vector.broadcast %58 : vector<1x128xf32> to vector<32x128xf32>
    %61 = arith.mulf %0, %60 : vector<32x128xf32>
    %62 = vector.broadcast %59 : vector<1x128xf32> to vector<32x128xf32>
    %63 = arith.addf %61, %62 : vector<32x128xf32>
    %cst_22 = arith.constant 0.000000e+00 : f32
    %64 = vector.broadcast %cst_22 : f32 to vector<32x128xf32>
    %65 = arith.maximumf %63, %64 : vector<32x128xf32>
    %c0_23 = arith.constant 0 : index
    %c0_24 = arith.constant 0 : index
    %66 = vector.load %arg6[%c0_23, %c0_24] : memref<1x128xf32, #tpu.memory_space<vmem>>, vector<1x128xf32>
    %67 = arith.truncf %65 : vector<32x128xf32> to vector<32x128xbf16>
    %c0_25 = arith.constant 0 : index
    %c0_26 = arith.constant 0 : index
    %68 = vector.load %arg5[%c0_25, %c0_26] : memref<128x384xbf16, #tpu.memory_space<vmem>>, vector<128x384xbf16>
    %cst_27 = arith.constant dense<0.000000e+00> : vector<32x384xf32>
    %69 = tpu.matmul %67, %68, %cst_27 {dimension_numbers = #tpu.dot_dimension_numbers<[1], [0], [0], [1], [0, 0, 1, 1], [], []>} : vector<32x128xbf16>, vector<128x384xbf16>, vector<32x384xf32> -> vector<32x384xf32>
    %cst_28 = arith.constant 0.000000e+00 : f32
    %70 = vector.broadcast %cst_28 : f32 to vector<1x128xf32>
    %71 = arith.addf %70, %66 : vector<1x128xf32>
    %72 = vector.extract_strided_slice %69 {offsets = [0, 0], sizes = [32, 128], strides = [1, 1]} : vector<32x384xf32> to vector<32x128xf32>
    %c1_i32 = arith.constant 1 : i32
    %73 = tpu.dynamic_rotate %72 by %c1_i32 dim 0 : vector<32x128xf32>, i32 -> vector<32x128xf32>
    %74 = vector.broadcast %11 : vector<32x1xf32> to vector<32x128xf32>
    %75 = arith.mulf %73, %74 : vector<32x128xf32>
    %76 = vector.broadcast %71 : vector<1x128xf32> to vector<32x128xf32>
    %77 = arith.addf %76, %75 : vector<32x128xf32>
    %78 = vector.extract_strided_slice %69 {offsets = [0, 128], sizes = [32, 128], strides = [1, 1]} : vector<32x384xf32> to vector<32x128xf32>
    %79 = arith.addf %77, %78 : vector<32x128xf32>
    %80 = vector.extract_strided_slice %69 {offsets = [0, 256], sizes = [32, 128], strides = [1, 1]} : vector<32x384xf32> to vector<32x128xf32>
    %c31_i32 = arith.constant 31 : i32
    %81 = tpu.dynamic_rotate %80 by %c31_i32 dim 0 : vector<32x128xf32>, i32 -> vector<32x128xf32>
    %82 = vector.broadcast %21 : vector<32x1xf32> to vector<32x128xf32>
    %83 = arith.mulf %81, %82 : vector<32x128xf32>
    %84 = arith.addf %79, %83 : vector<32x128xf32>
    %c0_29 = arith.constant 0 : index
    %c0_30 = arith.constant 0 : index
    %85 = vector.load %arg7[%c0_29, %c0_30] : memref<1x32xf32, #tpu.memory_space<vmem>>, vector<1x32xf32>
    %c0_31 = arith.constant 0 : index
    %c0_32 = arith.constant 0 : index
    %86 = vector.load %arg8[%c0_31, %c0_32] : memref<1x32xf32, #tpu.memory_space<vmem>>, vector<1x32xf32>
    %cst_33 = arith.constant 1.000000e+00 : f32
    %87 = vector.broadcast %cst_33 : f32 to vector<1x32xf32>
    %88 = arith.mulf %84, %84 : vector<32x128xf32>
    %89 = tpu.concatenate %84, %88 in 1 : vector<32x128xf32>, vector<32x128xf32> -> vector<32x256xf32>
    %cst_34 = arith.constant dense<0.000000e+00> : vector<1x256xf32>
    %90 = tpu.matmul %87, %89, %cst_34 {dimension_numbers = #tpu.dot_dimension_numbers<[1], [0], [0], [1], [0, 0, 1, 1], [], []>} : vector<1x32xf32>, vector<32x256xf32>, vector<1x256xf32> -> vector<1x256xf32>
    %91 = vector.extract_strided_slice %90 {offsets = [0, 0], sizes = [1, 128], strides = [1, 1]} : vector<1x256xf32> to vector<1x128xf32>
    %92 = vector.extract_strided_slice %90 {offsets = [0, 128], sizes = [1, 128], strides = [1, 1]} : vector<1x256xf32> to vector<1x128xf32>
    %93 = vector.extract_strided_slice %91 {offsets = [0, 0], sizes = [1, 32], strides = [1, 1]} : vector<1x128xf32> to vector<1x32xf32>
    %94 = vector.extract_strided_slice %92 {offsets = [0, 0], sizes = [1, 32], strides = [1, 1]} : vector<1x128xf32> to vector<1x32xf32>
    %95 = vector.extract_strided_slice %91 {offsets = [0, 32], sizes = [1, 32], strides = [1, 1]} : vector<1x128xf32> to vector<1x32xf32>
    %96 = arith.addf %93, %95 : vector<1x32xf32>
    %97 = vector.extract_strided_slice %92 {offsets = [0, 32], sizes = [1, 32], strides = [1, 1]} : vector<1x128xf32> to vector<1x32xf32>
    %98 = arith.addf %94, %97 : vector<1x32xf32>
    %99 = vector.extract_strided_slice %91 {offsets = [0, 64], sizes = [1, 32], strides = [1, 1]} : vector<1x128xf32> to vector<1x32xf32>
    %100 = arith.addf %96, %99 : vector<1x32xf32>
    %101 = vector.extract_strided_slice %92 {offsets = [0, 64], sizes = [1, 32], strides = [1, 1]} : vector<1x128xf32> to vector<1x32xf32>
    %102 = arith.addf %98, %101 : vector<1x32xf32>
    %103 = vector.extract_strided_slice %91 {offsets = [0, 96], sizes = [1, 32], strides = [1, 1]} : vector<1x128xf32> to vector<1x32xf32>
    %104 = arith.addf %100, %103 : vector<1x32xf32>
    %105 = vector.extract_strided_slice %92 {offsets = [0, 96], sizes = [1, 32], strides = [1, 1]} : vector<1x128xf32> to vector<1x32xf32>
    %106 = arith.addf %102, %105 : vector<1x32xf32>
    %cst_35 = arith.constant 7.812500e-03 : f32
    %107 = vector.broadcast %cst_35 : f32 to vector<1x32xf32>
    %108 = arith.mulf %104, %107 : vector<1x32xf32>
    %cst_36 = arith.constant 7.812500e-03 : f32
    %109 = vector.broadcast %cst_36 : f32 to vector<1x32xf32>
    %110 = arith.mulf %106, %109 : vector<1x32xf32>
    %111 = arith.mulf %108, %108 : vector<1x32xf32>
    %112 = arith.subf %110, %111 : vector<1x32xf32>
    %cst_37 = arith.constant 0.000000e+00 : f32
    %113 = vector.broadcast %cst_37 : f32 to vector<1x32xf32>
    %114 = arith.maximumf %112, %113 : vector<1x32xf32>
    %cst_38 = arith.constant 9.99999974E-6 : f32
    %115 = vector.broadcast %cst_38 : f32 to vector<1x32xf32>
    %116 = arith.addf %114, %115 : vector<1x32xf32>
    %117 = math.rsqrt %116 : vector<1x32xf32>
    %118 = arith.mulf %85, %117 : vector<1x32xf32>
    %119 = arith.mulf %108, %118 : vector<1x32xf32>
    %120 = arith.subf %86, %119 : vector<1x32xf32>
    %121 = tpu.concatenate %118, %118, %118, %118 in 1 : vector<1x32xf32>, vector<1x32xf32>, vector<1x32xf32>, vector<1x32xf32> -> vector<1x128xf32>
    %122 = tpu.concatenate %120, %120, %120, %120 in 1 : vector<1x32xf32>, vector<1x32xf32>, vector<1x32xf32>, vector<1x32xf32> -> vector<1x128xf32>
    %123 = vector.broadcast %121 : vector<1x128xf32> to vector<32x128xf32>
    %124 = arith.mulf %84, %123 : vector<32x128xf32>
    %125 = vector.broadcast %122 : vector<1x128xf32> to vector<32x128xf32>
    %126 = arith.addf %124, %125 : vector<32x128xf32>
    %cst_39 = arith.constant 0.000000e+00 : f32
    %127 = vector.broadcast %cst_39 : f32 to vector<32x128xf32>
    %128 = arith.maximumf %126, %127 : vector<32x128xf32>
    %c0_40 = arith.constant 0 : index
    %c0_41 = arith.constant 0 : index
    %129 = vector.load %arg10[%c0_40, %c0_41] : memref<1x128xf32, #tpu.memory_space<vmem>>, vector<1x128xf32>
    %130 = arith.truncf %128 : vector<32x128xf32> to vector<32x128xbf16>
    %c0_42 = arith.constant 0 : index
    %c0_43 = arith.constant 0 : index
    %131 = vector.load %arg9[%c0_42, %c0_43] : memref<128x384xbf16, #tpu.memory_space<vmem>>, vector<128x384xbf16>
    %cst_44 = arith.constant dense<0.000000e+00> : vector<32x384xf32>
    %132 = tpu.matmul %130, %131, %cst_44 {dimension_numbers = #tpu.dot_dimension_numbers<[1], [0], [0], [1], [0, 0, 1, 1], [], []>} : vector<32x128xbf16>, vector<128x384xbf16>, vector<32x384xf32> -> vector<32x384xf32>
    %133 = vector.broadcast %129 : vector<1x128xf32> to vector<32x128xf32>
    %134 = arith.addf %0, %133 : vector<32x128xf32>
    %135 = vector.extract_strided_slice %132 {offsets = [0, 0], sizes = [32, 128], strides = [1, 1]} : vector<32x384xf32> to vector<32x128xf32>
    %c1_i32_45 = arith.constant 1 : i32
    %136 = tpu.dynamic_rotate %135 by %c1_i32_45 dim 0 : vector<32x128xf32>, i32 -> vector<32x128xf32>
    %137 = vector.broadcast %11 : vector<32x1xf32> to vector<32x128xf32>
    %138 = arith.mulf %136, %137 : vector<32x128xf32>
    %139 = arith.addf %134, %138 : vector<32x128xf32>
    %140 = vector.extract_strided_slice %132 {offsets = [0, 128], sizes = [32, 128], strides = [1, 1]} : vector<32x384xf32> to vector<32x128xf32>
    %141 = arith.addf %139, %140 : vector<32x128xf32>
    %142 = vector.extract_strided_slice %132 {offsets = [0, 256], sizes = [32, 128], strides = [1, 1]} : vector<32x384xf32> to vector<32x128xf32>
    %c31_i32_46 = arith.constant 31 : i32
    %143 = tpu.dynamic_rotate %142 by %c31_i32_46 dim 0 : vector<32x128xf32>, i32 -> vector<32x128xf32>
    %144 = vector.broadcast %21 : vector<32x1xf32> to vector<32x128xf32>
    %145 = arith.mulf %143, %144 : vector<32x128xf32>
    %146 = arith.addf %141, %145 : vector<32x128xf32>
    %c0_47 = arith.constant 0 : index
    %c0_48 = arith.constant 0 : index
    %147 = vector.load %arg11[%c0_47, %c0_48] : memref<32x128xf32, #tpu.memory_space<vmem>>, vector<32x128xf32>
    tpu.vector_store %arg11[%c0_47, %c0_48], %146 {strides = array<i32>} : memref<32x128xf32, #tpu.memory_space<vmem>>, vector<32x128xf32>,
    return
  }
}

</mosaic_0001>

<bundles_post_ra>
// kernel: tpu_custom_call.1
= control target key start
LH: loop header
LB: loop body
LE: loop exit
PB: predicated region body
PF: predicated region fallthrough
CT: control target
= control target key end

     0   :  { %16 = vsyncpa [#allocation3], 0  ;;  %s1796_s0 = inlined_call_operand.vmem [shape: f32[32,128], index: 0, kind: input, shape index: {}]   ;;  %s1797_s1 = inlined_call_operand.vmem [shape: f32[32,1], index: 1, kind: input, shape index: {}]   ;;  %s1798_s2 = inlined_call_operand.hbm [shape: f32[32,128], index: 2, kind: input, shape index: {}]   ;;  %s1799_s3 = inlined_call_operand.vmem [shape: f32[1,32], index: 3, kind: input, shape index: {}]   ;;  %s1800_s4 = inlined_call_operand.vmem [shape: f32[1,32], index: 4, kind: input, shape index: {}]   ;;  %s1801_s5 = inlined_call_operand.hbm [shape: bf16[128,384], index: 5, kind: input, shape index: {}]   ;;  %s1802_s6 = inlined_call_operand.vmem [shape: f32[1,128], index: 6, kind: input, shape index: {}]   ;;  %s1803_s7 = inlined_call_operand.vmem [shape: f32[1,32], index: 7, kind: input, shape index: {}]   ;;  %s1804_s8 = inlined_call_operand.vmem [shape: f32[1,32], index: 8, kind: input, shape index: {}]   ;;  %s1805_s9 = inlined_call_operand.hbm [shape: bf16[128,384], index: 9, kind: input, shape index: {}]   ;;  %s1806_s10 = inlined_call_operand.vmem [shape: f32[1,128], index: 10, kind: input, shape index: {}]   ;;  %s1807_s11 = inlined_call_operand.hbm [shape: f32[32,128], index: 11, kind: output, shape index: {}]  }
   0x1   :  { %17 = vsyncpa [#allocation6], 0 }
   0x2   :  { %18 = vsyncpa [#allocation4], 0  ;;  %s1452_s17 = smov [#allocation5]  }
   0x3   :  { %s44_s18 = sshll.u32 %s1452_s17, 4  ;;  %s45_s18 = int_to_ptr.vmem [resolvable:$true] %s44_s18 }
   0x4   :  { %s1374_s19 = scalar_lea.vmem %s45_s18, 3072  ;;  %p1379_p1 = scmp.lt.s32.totalorder %s45_s18, %s45_s18 }
   0x5   :  { %p1375_p0 = scmp.ne.s32.totalorder %s45_s18, %s1374_s19  ;;  %p1380_p2 = scmp.lt.s32.totalorder %s1374_s19, %s1374_s19 }
   0x7   :  { %p1381_p3 = por %p1380_p2, %p1379_p1 }
   0x9   :  { %p1382_p4 = pnand %p1381_p3, %p1375_p0 }
   0xb   :  { %1385 = shalt.err (!%p1382_p4)
}
   0xc   :  { %s1453_s20 = smov 192   ;;  %s1454_s21 = smov 12  }
   0xd   :  { %50 = dma.hbm_to_vmem [thread:$0]  %s1801_s5, 3072, %s45_s18, [#allocation6], %s1453_s20, %s1453_s20, %s1454_s21  }
   0xe   :  { %s1455_s24 = smov [#allocation2]  }
   0xf   :  { %s28_s25 = sshll.u32 %s1455_s24, 4  ;;  %s29_s25 = int_to_ptr.vmem [resolvable:$true] %s28_s25 }
  0x10   :  { %s1394_s26 = scalar_lea.vmem %s29_s25, 512  ;;  %p1399_p6 = scmp.lt.s32.totalorder %s29_s25, %s29_s25 }
  0x11   :  { %p1395_p5 = scmp.ne.s32.totalorder %s29_s25, %s1394_s26  ;;  %p1400_p7 = scmp.lt.s32.totalorder %s1394_s26, %s1394_s26 }
  0x13   :  { %p1401_p8 = por %p1400_p7, %p1399_p6 }
  0x15   :  { %p1402_p9 = pnand %p1401_p8, %p1395_p5 }
  0x17   :  { %1405 = shalt.err (!%p1402_p9)
}
  0x18   :  { %s1456_s27 = smov 128   ;;  %s1457_s28 = smov 8  }
  0x19   :  { %34 = dma.hbm_to_vmem [thread:$0]  %s1798_s2, 512, %s29_s25, [#allocation3], %s1456_s27, %s1456_s27, %s1457_s28  }
  0x1a   :  { %s1458_s5 = smov [#allocation7]  }
  0x1b   :  { %s62_s12 = sshll.u32 %s1458_s5, 4  ;;  %s63_s12 = int_to_ptr.vmem [resolvable:$true] %s62_s12 }
  0x1c   :  { %s1414_s13 = scalar_lea.vmem %s63_s12, 3072  ;;  %p1419_p11 = scmp.lt.s32.totalorder %s63_s12, %s63_s12 }
  0x1d   :  { %p1415_p10 = scmp.ne.s32.totalorder %s63_s12, %s1414_s13  ;;  %p1420_p12 = scmp.lt.s32.totalorder %s1414_s13, %s1414_s13 }
  0x1f   :  { %p1421_p13 = por %p1420_p12, %p1419_p11 }
  0x21   :  { %p1422_p0 = pnand %p1421_p13, %p1415_p10 }
  0x23   :  { %1425 = shalt.err (!%p1422_p0)
}
  0x24   :  { %68 = dma.hbm_to_vmem [thread:$0]  %s1805_s9, 3072, %s63_s12, [#allocation6], %s1453_s20, %s1453_s20, %s1454_s21  }
  0x25   :  { %1446 = dma.done.wait [#allocation3], 512  }
  0x26   :  { %1447 = vsyncadd [#allocation3], 4294966784 }
  0x27   :  { %1448 = dma.done.wait [#allocation6], 6144  }
  0x28   :  { %1449 = vsyncadd [#allocation6], 4294961152  ;;  %v1459_v0 = vmov 0.0   ;;  %v1542_v1 = vld [vmem:[%s1796_s0 + $0x18] sm:$0xff]  ;;  %v1547_v2 = vld [vmem:[%s1796_s0 + $0x10] sm:$0xff]  ;;  %vm1808_vm0 = vcmask 261120   ;;  %v247_v42 = vlaneseq }
  0x29   :  { %203 = vmatprep.mubr.f32.mxu0 %v1459_v0  ;;  %v1552_v3 = vld [vmem:[%s1796_s0 + $0x8] sm:$0xff]  ;;  %v134_v4 = vmul.f32 %v1542_v1, %v1542_v1  ;;  %v133_v5 = vmul.f32 %v1547_v2, %v1547_v2  ;;  %v1561_v6 = vld [vmem:[%s1796_s0] sm:$0xff]  ;;  %v1460_v9 = vmov 1.0   ;;  %s1461_s21 = smov 64   ;;  %s1462_s23 = smov 96  }
  0x2a   :  { %v132_v7 = vmul.f32 %v1552_v3, %v1552_v3  ;;  %v131_v8 = vmul.f32 %v1561_v6, %v1561_v6  ;;  %s1463_s24 = smov 32   ;;  %v1297_v12 = vld [vmem:[#allocation5 + $0xac] ss:$12 sps:$4 sm:$0xff]   ;;  %v1299_v13 = vld [vmem:[#allocation5 + $0xa8] ss:$12 sps:$4 sm:$0xff]   ;;  %v1579_v46 = vshrl.u32 %v247_v42, 7 }
  0x2b   :  { %163 = vmatprep.subr.mxu0 %v134_v4  ;;  %v1300_v14 = vld [vmem:[#allocation5 + $0xb0] ss:$12 sps:$4 sm:$0xff]   ;;  %v1301_v15 = vld [vmem:[#allocation5 + $0x94] ss:$12 sps:$4 sm:$0xff]   ;;  %v1304_v16 = vld [vmem:[#allocation5 + $0x98] ss:$12 sps:$4 sm:$0xff]   ;;  %465 = vmatprep.subr.bf16.mxu1 %v1297_v12 }
  0x2c   :  { %164 = vmatpush1.msra.mxu0 %v1542_v1  ;;  %466 = vmatpush1.bf16.msra.mxu1 %v1299_v13  ;;  %v1303_v17 = vld [vmem:[#allocation5 + $0x90] ss:$12 sps:$4 sm:$0xff]   ;;  %v1308_v19 = vld [vmem:[#allocation5 + $0x80] ss:$12 sps:$4 sm:$0xff]   ;;  %v1307_v20 = vld [vmem:[#allocation5 + $0x78] ss:$12 sps:$4 sm:$0xff]  }
  0x2d   :  { %165 = vmatprep.subr.mxu0 %v133_v5  ;;  %467 = vmatprep.subr.bf16.mxu1 %v1301_v15  ;;  %v1305_v18 = vld [vmem:[#allocation5 + $0x7c] ss:$12 sps:$4 sm:$0xff]   ;;  %v1309_v21 = vld [vmem:[#allocation5 + $0x64] ss:$12 sps:$4 sm:$0xff]   ;;  %v1311_v23 = vld [vmem:[#allocation5 + $0x60] ss:$12 sps:$4 sm:$0xff]  }
  0x2e   :  { %166 = vmatpush1.msra.mxu0 %v1547_v2  ;;  %v1312_v22 = vld [vmem:[#allocation5 + $0x68] ss:$12 sps:$4 sm:$0xff]   ;;  %v1313_v43 = vld [vmem:[#allocation5 + $0x4c] ss:$12 sps:$4 sm:$0xff]   ;;  %v1316_v45 = vld [vmem:[#allocation5 + $0x50] ss:$12 sps:$4 sm:$0xff]  }
  0x2f   :  { %167 = vmatprep.subr.mxu0 %v132_v7  ;;  %v1315_v44 = vld [vmem:[#allocation5 + $0x48] ss:$12 sps:$4 sm:$0xff]   ;;  %v1319_v48 = vld [vmem:[#allocation5 + $0x30] ss:$12 sps:$4 sm:$0xff]   ;;  %v1320_v49 = vld [vmem:[#allocation5 + $0x38] ss:$12 sps:$4 sm:$0xff]  }
  0x30   :  { %168 = vmatpush1.msra.mxu0 %v1552_v3  ;;  %468 = vmatpush1.bf16.msra.mxu1 %v1303_v17  ;;  %v1317_v47 = vld [vmem:[#allocation5 + $0x34] ss:$12 sps:$4 sm:$0xff]   ;;  %v1585_v51 = vsub.s32 0, %v1579_v46  ;;  %v1321_v53 = vld [vmem:[#allocation5 + $0x1c] ss:$12 sps:$4 sm:$0xff]   ;;  %v1464_v4 = vmov 0  }
  0x31   :  { %169 = vmatprep.subr.mxu0 %v131_v8  ;;  %469 = vmatprep.subr.bf16.mxu1 %v1305_v18  ;;  %v129_v50 = vld [vmem:[%s1799_s3] sm:$0x1]  ;;  %v1323_v55 = vld [vmem:[#allocation5 + $0x18] ss:$12 sps:$4 sm:$0xff]   ;;  %v1328_v59 = vld [vmem:[#allocation5 + $0x8] ss:$12 sps:$4 sm:$0xff]  }
  0x32   :  { %170 = vmatpush1.msra.mxu0 %v1561_v6  ;;  %v1324_v56 = vld [vmem:[#allocation5 + $0x20] ss:$12 sps:$4 sm:$0xff]   ;;  %v1325_v58 = vld [vmem:[#allocation5 + $0x4] ss:$12 sps:$4 sm:$0xff]   ;;  %497 = vmatprep.mubr.bf16.mxu1 %v1464_v4  ;;  %v88_v8 = vld [vmem:[%s1797_s1 + $0x18] sm:$0xff] }
  0x33   :  { %1154 = vmatmul.mubr.msk.f32.vlgmr.msra.gmra.mxu0 %vm1808_vm0, %v1460_v9  ;;  %1226 = vmatprep.subr.bf16.mxu0 %v1300_v14  ;;  %v130_v57 = vld [vmem:[%s1800_s4] sm:$0x1]  ;;  %v86_v7 = vld [vmem:[%s1797_s1 + $0x8] sm:$0xff]  ;;  %v112_v12 = vadd.f32 1.0, %v88_v8 }
  0x34   :  { %1227 = vmatpush3.bf16.msra.mxu0 %v1300_v14  ;;  %470 = vmatpush1.bf16.msra.mxu1 %v1307_v20  ;;  %v1327_v62 = vld [vmem:[#allocation5] ss:$12 sps:$4 sm:$0xff]   ;;  %v92_v14 = vadd.f32 -1.0, %v88_v8  ;;  %v110_v18 = vadd.f32 1.0, %v86_v7 }
  0x35   :  { %1228 = vmatprep.subr.bf16.mxu0 %v1304_v16  ;;  %471 = vmatprep.subr.bf16.mxu1 %v1309_v21  ;;  %v85_v15 = vld [vmem:[%s1797_s1] sm:$0xff]  ;;  %vm116_vm3 = vcmp.ge.f32.partialorder %v112_v12, 0.0  ;;  %vm120_vm4 = vcmp.le.f32.partialorder %v112_v12, 15.0 }
  0x36   :  { %1286 = vset.pattern.permute.xlu1 %v1464_v4  ;;  %1280 = vset.pattern.permute.xlu0 %v1464_v4  ;;  %vm96_vm7 = vcmp.ge.f32.partialorder %v92_v14, 0.0  ;;  %vm100_vm9 = vcmp.le.f32.partialorder %v92_v14, 15.0  ;;  %vm124_vm10 = vmand %vm116_vm3, %vm120_vm4 }
  0x37   :  { %v128_v21 = vsel %vm124_vm10, 1.0, %v1459_v0  ;;  %vm104_vm0 = vmand %vm96_vm7, %vm100_vm9  ;;  %vm263_vm9 = vcmask 785408  }
  0x38   :  { %1229 = vmatpush3.bf16.msra.mxu0 %v1304_v16  ;;  %472 = vmatpush1.bf16.msra.mxu1 %v1311_v23  ;;  %v89_v16 = vadd.f32 -1.0, %v85_v15 }
  0x39   :  { %1230 = vmatprep.subr.bf16.mxu0 %v1308_v19  ;;  %473 = vmatprep.subr.bf16.mxu1 %v1313_v43 }
  0x3a   :  { %vm93_vm11 = vcmp.ge.f32.partialorder %v89_v16, 0.0  ;;  %vm97_vm12 = vcmp.le.f32.partialorder %v89_v16, 15.0 }
  0x3c   :  { %1231 = vmatpush3.bf16.msra.mxu0 %v1308_v19  ;;  %474 = vmatpush1.bf16.msra.mxu1 %v1315_v44  ;;  %v109_v19 = vadd.f32 1.0, %v85_v15 }
  0x3d   :  { %1232 = vmatprep.subr.bf16.mxu0 %v1312_v22  ;;  %475 = vmatprep.subr.bf16.mxu1 %v1317_v47 }
  0x3e   :  { %vm113_vm3 = vcmp.ge.f32.partialorder %v109_v19, 0.0  ;;  %vm117_vm4 = vcmp.le.f32.partialorder %v109_v19, 15.0 }
  0x3f   :  { %vm121_vm7 = vmand %vm113_vm3, %vm117_vm4 }
  0x40   :  { %1233 = vmatpush3.bf16.msra.mxu0 %v1312_v22  ;;  %476 = vmatpush1.bf16.msra.mxu1 %v1319_v48 }
  0x41   :  { %1234 = vmatprep.subr.bf16.mxu0 %v1316_v45  ;;  %477 = vmatprep.subr.bf16.mxu1 %v1321_v53 }
  0x44   :  { %1235 = vmatpush3.bf16.msra.mxu0 %v1316_v45  ;;  %478 = vmatpush1.bf16.msra.mxu1 %v1323_v55 }
  0x45   :  { %1236 = vmatprep.subr.bf16.mxu0 %v1320_v49  ;;  %479 = vmatprep.subr.bf16.mxu1 %v1325_v58 }
  0x48   :  { %1237 = vmatpush3.bf16.msra.mxu0 %v1320_v49  ;;  %480 = vmatpush1.bf16.msra.mxu1 %v1327_v62 }
  0x49   :  { %1238 = vmatprep.subr.bf16.mxu0 %v1324_v56 }
  0x4c   :  { %1239 = vmatpush3.bf16.msra.mxu0 %v1324_v56 }
  0x4d   :  { %1240 = vmatprep.subr.bf16.mxu0 %v1328_v59 }
  0x50   :  { %1241 = vmatpush3.bf16.msra.mxu0 %v1328_v59 }
  0xf3   :  { %v205_v10 = vpop.f32.mrf.mxu0 }
  0xf4   :  { %220 = vrot.lane.b32.xlu1 %v205_v10, %s1461_s21  ;;  %211 = vrot.lane.b32.xlu0 %v205_v10, %s1462_s23 }
  0xf5   :  { %v207_v11 = vpop.f32.mrf.mxu0 }
  0xf8   :  { %224 = vrot.lane.b32.xlu1 %v207_v11, %s1461_s21  ;;  %216 = vrot.lane.b32.xlu0 %v207_v11, %s1462_s23 }
  0xfc   :  { %232 = vrot.lane.b32.xlu1 %v207_v11, %s1463_s24  ;;  %228 = vrot.lane.b32.xlu0 %v205_v10, %s1463_s24 }
 0x166   :  { %v221_v24 = vpop.permute.xlu1 %220  ;;  %v212_v25 = vpop.permute.xlu0 %211 }
 0x167   :  { %v214_v26 = vadd.f32 %v212_v25, %v205_v10  ;;  %v87_v10 = vld [vmem:[%s1797_s1 + $0x10] sm:$0xff] }
 0x168   :  { %v91_v13 = vadd.f32 -1.0, %v87_v10  ;;  %v111_v17 = vadd.f32 1.0, %v87_v10 }
 0x169   :  { %v223_v31 = vadd.f32 %v221_v24, %v214_v26  ;;  %v108_v24 = vsel %vm104_vm0, 1.0, %v1459_v0  ;;  %vm1809_vm0 = vcmask 261120  }
 0x16a   :  { %v225_v27 = vpop.permute.xlu1 %224  ;;  %v217_v28 = vpop.permute.xlu0 %216  ;;  %vm95_vm6 = vcmp.ge.f32.partialorder %v91_v13, 0.0  ;;  %vm99_vm8 = vcmp.le.f32.partialorder %v91_v13, 15.0  ;;  %vm115_vm14 = vcmp.ge.f32.partialorder %v111_v17, 0.0  ;;  %vm119_vm15 = vcmp.le.f32.partialorder %v111_v17, 15.0 }
 0x16b   :  { %v219_v29 = vadd.f32 %v217_v28, %v207_v11  ;;  %v90_v11 = vadd.f32 -1.0, %v86_v7  ;;  %vm103_vm13 = vmand %vm95_vm6, %vm99_vm8  ;;  %vm261_vm8 = vcmask 523264  }
 0x16c   :  { %v107_v23 = vsel %vm103_vm13, 1.0, %v1459_v0  ;;  %vm123_vm10 = vmand %vm115_vm14, %vm119_vm15  ;;  %vm621_vm13 = vcmp.lt.s32.totalorder %v1579_v46, 7 }
 0x16d   :  { %v227_v30 = vadd.f32 %v225_v27, %v219_v29  ;;  %vm94_vm1 = vcmp.ge.f32.partialorder %v90_v11, 0.0  ;;  %vm98_vm2 = vcmp.le.f32.partialorder %v90_v11, 15.0  ;;  %v1281_v25 = vpack.i.bf16 %v107_v23, %v108_v24  ;;  %vm1811_vm14 = vmmov %vm1809_vm0 }
 0x16e   :  { %v233_v32 = vpop.permute.xlu1 %232  ;;  %v229_v33 = vpop.permute.xlu0 %228  ;;  %vm102_vm5 = vmand %vm94_vm1, %vm98_vm2  ;;  %vm114_vm1 = vcmp.ge.f32.partialorder %v110_v18, 0.0  ;;  %vm118_vm2 = vcmp.le.f32.partialorder %v110_v18, 15.0  ;;  %v127_v27 = vsel %vm123_vm10, 1.0, %v1459_v0 }
 0x16f   :  { %v235_v34 = vadd.f32 %v233_v32, %v227_v30  ;;  %v231_v35 = vadd.f32 %v229_v33, %v223_v31  ;;  %v106_v20 = vsel %vm102_vm5, 1.0, %v1459_v0  ;;  %vm101_vm5 = vmand %vm93_vm11, %vm97_vm12  ;;  %v125_v30 = vsel %vm121_vm7, 1.0, %v1459_v0 }
 0x170   :  { %v1287_v22 = vpack.i.bf16 %v128_v21, %v106_v20  ;;  %v105_v26 = vsel %vm101_vm5, 1.0, %v1459_v0  ;;  %vm122_vm6 = vmand %vm114_vm1, %vm118_vm2  ;;  %vm574_vm12 = vcmp.lt.s32.totalorder %v1579_v46, 1 }
 0x171   :  { %v236_v36 = vmul.f32 0.0078125, %v231_v35  ;;  %v237_v37 = vmul.f32 0.0078125, %v235_v34  ;;  %v1292_v28 = vpack.i.bf16 %v127_v27, %v105_v26  ;;  %v126_v29 = vsel %vm122_vm6, 1.0, %v1459_v0  ;;  %vm1810_vm11 = vmmov %vm1809_vm0 }
 0x172   :  { %vm1812_vm15 = vmmov %vm1809_vm0 }
 0x173   :  { %v238_v38 = vmul.f32 %v236_v36, %v236_v36  ;;  %vm1813_vm1 = vmmov %vm1809_vm0 }
 0x175   :  { %v239_v39 = vsub.f32 %v237_v37, %v238_v38 }
 0x177   :  { %v240_v40 = vmax.f32 %v239_v39, 0.0 }
 0x179   :  { %v241_v41 = vadd.f32 1e-05, %v240_v40 }
 0x17b   :  { %1361 = vrsqrt.f32 %v241_v41 }
 0x188   :  { %v1362_v52 = vpop.eup %1361 }
 0x189   :  { %v1587_v54 = vmul.f32 %v1362_v52, %v129_v50 }
 0x18b   :  { %v244_v60 = vmul.f32 %v1587_v54, %v236_v36  ;;  %v250_v61 = vrot.slane %v1587_v54, %v1585_v51 }
 0x18d   :  { %v1595_v63 = vsub.f32 %v130_v57, %v244_v60  ;;  %254 = vrot.lane.b32.xlu1 %v250_v61, %s1461_s21  ;;  %251 = vrot.lane.b32.xlu0 %v250_v61, %s1463_s24 }
 0x18f   :  { %v269_v5 = vrot.slane %v1595_v63, %v1585_v51 }
 0x191   :  { %257 = vrot.lane.b32.xlu0 %v250_v61, %s1462_s23  ;;  %270 = vrot.lane.b32.xlu1 %v269_v5, %s1463_s24 }
 0x195   :  { %273 = vrot.lane.b32.xlu0 %v269_v5, %s1461_s21  ;;  %276 = vrot.lane.b32.xlu1 %v269_v5, %s1462_s23 }
 0x199   :  { %1288 = vperm.xlu1 %1286, %v1287_v22   ;;  %1282 = vperm.xlu0 %1280, %v1281_v25  }
 0x19d   :  { %1293 = vperm.xlu1 %1286, %v1292_v28   ;;  %633 = vperm.xlu0 %1280, %v126_v29   ;;  %v1179_v28 = vld [vmem:[%s1802_s6] ss:$0 sm:$0xff] }
 0x1a1   :  { %628 = vperm.xlu1 %1286, %v125_v30  }
 0x1ff   :  { %v255_v31 = vpop.permute.xlu1 %254  ;;  %v252_v32 = vpop.permute.xlu0 %251 }
 0x200   :  { %v260_v33 = vsel %vm1809_vm0, %v1587_v54, %v252_v32 }
 0x201   :  { %v262_v34 = vsel %vm261_vm8, %v260_v33, %v255_v31 }
 0x203   :  { %v258_v35 = vpop.permute.xlu0 %257  ;;  %v271_v36 = vpop.permute.xlu1 %270 }
 0x204   :  { %v264_v37 = vsel %vm263_vm9, %v262_v34, %v258_v35  ;;  %v279_v39 = vsel %vm1810_vm11, %v1595_v63, %v271_v36 }
 0x205   :  { %v285_v38 = vrot.slane %v264_v37, %v1585_v51 }
 0x207   :  { %v274_v40 = vpop.permute.xlu0 %273  ;;  %v277_v41 = vpop.permute.xlu1 %276  ;;  %v288_v43 = vmul.f32 %v285_v38, %v1547_v2  ;;  %v289_v45 = vmul.f32 %v285_v38, %v1542_v1  ;;  %v286_v48 = vmul.f32 %v285_v38, %v1561_v6  ;;  %v287_v49 = vmul.f32 %v285_v38, %v1552_v3 }
 0x208   :  { %v280_v42 = vsel %vm261_vm8, %v279_v39, %v274_v40 }
 0x209   :  { %v281_v44 = vsel %vm263_vm9, %v280_v42, %v277_v41 }
 0x20a   :  { %v293_v47 = vrot.slane %v281_v44, %v1585_v51 }
 0x20c   :  { %v294_v50 = vadd.f32 %v293_v47, %v286_v48  ;;  %v295_v52 = vadd.f32 %v293_v47, %v287_v49  ;;  %v296_v53 = vadd.f32 %v293_v47, %v288_v43  ;;  %v297_v54 = vadd.f32 %v293_v47, %v289_v45 }
 0x20e   :  { %v298_v55 = vmax.f32 %v294_v50, 0.0  ;;  %v299_v56 = vmax.f32 %v295_v52, 0.0  ;;  %v300_v57 = vmax.f32 %v296_v53, 0.0  ;;  %v301_v58 = vmax.f32 %v297_v54, 0.0 }
 0x210   :  { %v303_v59 = vpack.c.bf16 %v299_v56, %v298_v55  ;;  %v304_v60 = vpack.c.bf16 %v301_v58, %v300_v57 }
 0x212   :  { %498 = vmatmul.mubr.bf16.vlgmr.msra.gmra.mxu1 %v303_v59  ;;  %1242 = vmatprep.mubr.bf16.mxu0 %v303_v59 }
 0x213   :  { %1243 = vmatmul.mubr.bf16.vlgmr.msra.gmra.mxu0 %v304_v60  ;;  %507 = vmatprep.mubr.bf16.mxu1 %v1464_v4 }
 0x214   :  { %724 = vmatprep.mubr.f32.mxu0 %v1459_v0  ;;  %v1645_v7 = vpop.permute.xlu1 %1288  ;;  %v1648_v13 = vpop.permute.xlu0 %1282 }
 0x215   :  { %v1290_v0 = vunpack.i.l.bf16 %v1645_v7  ;;  %v1285_v14 = vunpack.i.h.bf16 %v1648_v13  ;;  %v1284_v20 = vunpack.i.l.bf16 %v1648_v13  ;;  %v1291_v32 = vunpack.i.h.bf16 %v1645_v7 }
 0x218   :  { %v1655_v21 = vpop.permute.xlu1 %1293  ;;  %v1682_v43 = vpop.permute.xlu0 %633 }
 0x219   :  { %v1295_v25 = vunpack.i.l.bf16 %v1655_v21  ;;  %v1296_v35 = vunpack.i.h.bf16 %v1655_v21 }
 0x21a   :  { %508 = vmatmul.mubr.bf16.gmra.mxu1 %v304_v60 }
 0x21b   :  { %1016 = vmatprep.mubr.bf16.mxu1 %v1464_v4 }
 0x21c   :  { %v1693_v57 = vpop.permute.xlu1 %628 }
 0x2d2   :  { %v499_v1 = vpop.f32.mrf.mxu1 }
 0x2d3   :  { %v1244_v61 = vpop.f32.mrf.mxu0  ;;  %v568_v12 = vrot.slane %v499_v1, 7 }
 0x2d4   :  { %v501_v62 = vpop.f32.mrf.mxu1  ;;  %v619_v31 = vrot.slane %v1244_v61, 1 }
 0x2d5   :  { %v552_v63 = vpop.f32.mrf.mxu0 }
 0x2d6   :  { %v503_v5 = vpop.f32.mrf.mxu1  ;;  %v617_v34 = vrot.slane %v552_v63, 1 }
 0x2d7   :  { %v569_v8 = vrot.slane %v503_v5, 7  ;;  %v1245_v10 = vpop.f32.mrf.mxu0 }
 0x2d8   :  { %v505_v11 = vpop.f32.mrf.mxu1  ;;  %v620_v23 = vrot.slane %v1245_v10, 1 }
 0x2d9   :  { %v577_v16 = vsel %vm574_vm12, %v568_v12, %v569_v8  ;;  %v555_v18 = vpop.f32.mrf.mxu0 }
 0x2da   :  { %v509_v15 = vpop.f32.mrf.mxu1  ;;  %v600_v24 = vmul.f32 %v1290_v0, %v577_v16  ;;  %v618_v29 = vrot.slane %v555_v18, 1  ;;  %v622_v39 = vsel %vm621_vm13, %v619_v31, %v620_v23  ;;  %v625_v42 = vsel %vm621_vm13, %v620_v23, %v617_v34  ;;  %v1331_v16 = vld [vmem:[#allocation7 + $0xac] ss:$12 sps:$4 sm:$0xff]   ;;  %v1335_v18 = vld [vmem:[#allocation7 + $0x94] ss:$12 sps:$4 sm:$0xff]  }
 0x2db   :  { %v570_v17 = vrot.slane %v509_v15, 7  ;;  %v648_v49 = vmul.f32 %v1296_v35, %v622_v39  ;;  %v649_v55 = vmul.f32 %v1291_v32, %v625_v42  ;;  %v1329_v15 = vld [vmem:[#allocation7 + $0xa8] ss:$12 sps:$4 sm:$0xff]   ;;  %984 = vmatprep.subr.bf16.mxu1 %v1331_v16  ;;  %v1340_v23 = vld [vmem:[#allocation7 + $0x80] ss:$12 sps:$4 sm:$0xff]  }
 0x2dc   :  { %v511_v19 = vpop.f32.mrf.mxu1  ;;  %v610_v38 = vadd.f32 %v1179_v28, %v600_v24  ;;  %v623_v44 = vsel %vm621_vm13, %v618_v29, %v619_v31  ;;  %v624_v56 = vsel %vm621_vm13, %v617_v34, %v618_v29  ;;  %985 = vmatpush1.bf16.msra.mxu1 %v1329_v15  ;;  %v1337_v24 = vld [vmem:[#allocation7 + $0x78] ss:$12 sps:$4 sm:$0xff]  }
 0x2dd   :  { %v576_v22 = vsel %vm574_vm12, %v569_v8, %v570_v17  ;;  %v647_v53 = vmul.f32 %v1682_v43, %v623_v44  ;;  %v646_v61 = vmul.f32 %v1693_v57, %v624_v56  ;;  %986 = vmatprep.subr.bf16.mxu1 %v1335_v18  ;;  %v1349_v56 = vld [vmem:[#allocation7 + $0x30] ss:$12 sps:$4 sm:$0xff]  }
 0x2de   :  { %v601_v26 = vmul.f32 %v1285_v14, %v576_v22  ;;  %v513_v27 = vpop.f32.mrf.mxu1  ;;  %v614_v52 = vadd.f32 %v610_v38, %v505_v11  ;;  %v1339_v22 = vld [vmem:[#allocation7 + $0x7c] ss:$12 sps:$4 sm:$0xff]  }
 0x2df   :  { %v571_v30 = vrot.slane %v513_v27, 7  ;;  %v1344_v27 = vld [vmem:[#allocation7 + $0x68] ss:$12 sps:$4 sm:$0xff]  }
 0x2e0   :  { %v611_v33 = vadd.f32 %v1179_v28, %v601_v26  ;;  %v515_v50 = vpop.f32.mrf.mxu1  ;;  %v1699_v1 = vadd.f32 %v647_v53, %v614_v52  ;;  %v1343_v26 = vld [vmem:[#allocation7 + $0x64] ss:$12 sps:$4 sm:$0xff]   ;;  %v1345_v52 = vld [vmem:[#allocation7 + $0x48] ss:$12 sps:$4 sm:$0xff]   ;;  %v1347_v53 = vld [vmem:[#allocation7 + $0x4c] ss:$12 sps:$4 sm:$0xff]  }
 0x2e1   :  { %v575_v36 = vsel %vm574_vm12, %v570_v17, %v571_v30  ;;  %v578_v37 = vsel %vm574_vm12, %v571_v30, %v568_v12  ;;  %v1332_v17 = vld [vmem:[#allocation7 + $0xb0] ss:$12 sps:$4 sm:$0xff]  }
 0x2e2   :  { %v599_v40 = vmul.f32 %v1295_v25, %v578_v37  ;;  %v602_v41 = vmul.f32 %v1284_v20, %v575_v36  ;;  %v615_v45 = vadd.f32 %v611_v33, %v511_v19  ;;  %v1336_v19 = vld [vmem:[#allocation7 + $0x98] ss:$12 sps:$4 sm:$0xff]  }
 0x2e4   :  { %v609_v47 = vadd.f32 %v1179_v28, %v599_v40  ;;  %v612_v48 = vadd.f32 %v1179_v28, %v602_v41  ;;  %v1695_v58 = vadd.f32 %v648_v49, %v615_v45  ;;  %v1341_v28 = vld [vmem:[#allocation7 + $0x60] ss:$12 sps:$4 sm:$0xff]  }
 0x2e6   :  { %v616_v54 = vadd.f32 %v612_v48, %v515_v50  ;;  %v613_v59 = vadd.f32 %v609_v47, %v501_v62  ;;  %v658_v5 = vmul.f32 %v1695_v58, %v1695_v58  ;;  %v657_v62 = vmul.f32 %v1699_v1, %v1699_v1 }
 0x2e8   :  { %v1697_v60 = vadd.f32 %v649_v55, %v616_v54  ;;  %v1706_v8 = vadd.f32 %v646_v61, %v613_v59  ;;  %v1348_v54 = vld [vmem:[#allocation7 + $0x50] ss:$12 sps:$4 sm:$0xff]   ;;  %v1351_v55 = vld [vmem:[#allocation7 + $0x34] ss:$12 sps:$4 sm:$0xff]   ;;  %v1352_v59 = vld [vmem:[#allocation7 + $0x38] ss:$12 sps:$4 sm:$0xff]  }
 0x2e9   :  { %v654_v61 = vld [vmem:[%s1803_s7] sm:$0x1] }
 0x2ea   :  { %v659_v63 = vmul.f32 %v1697_v60, %v1697_v60  ;;  %v656_v10 = vmul.f32 %v1706_v8, %v1706_v8 }
 0x2ec   :  { %684 = vmatprep.subr.mxu0 %v659_v63 }
 0x2ed   :  { %685 = vmatpush1.msra.mxu0 %v1697_v60 }
 0x2ee   :  { %686 = vmatprep.subr.mxu0 %v658_v5  ;;  %v1355_v5 = vld [vmem:[#allocation7 + $0x1c] ss:$12 sps:$4 sm:$0xff]  }
 0x2ef   :  { %687 = vmatpush1.msra.mxu0 %v1695_v58 }
 0x2f0   :  { %688 = vmatprep.subr.mxu0 %v657_v62 }
 0x2f1   :  { %689 = vmatpush1.msra.mxu0 %v1699_v1 }
 0x2f2   :  { %690 = vmatprep.subr.mxu0 %v656_v10  ;;  %v1353_v10 = vld [vmem:[#allocation7 + $0x18] ss:$12 sps:$4 sm:$0xff]  }
 0x2f3   :  { %691 = vmatpush1.msra.mxu0 %v1706_v8 }
 0x2f4   :  { %1180 = vmatmul.mubr.msk.f32.vlgmr.msra.gmra.mxu0 %vm1811_vm14, %v1460_v9  ;;  %1246 = vmatprep.subr.bf16.mxu0 %v1332_v17  ;;  %v1333_v9 = vld [vmem:[#allocation7 + $0x90] ss:$12 sps:$4 sm:$0xff]  }
 0x2f5   :  { %1247 = vmatpush3.bf16.msra.mxu0 %v1332_v17  ;;  %987 = vmatpush1.bf16.msra.mxu1 %v1333_v9  ;;  %v1359_v17 = vld [vmem:[#allocation7 + $0x4] ss:$12 sps:$4 sm:$0xff]   ;;  %v1360_v9 = vld [vmem:[#allocation7 + $0x8] ss:$12 sps:$4 sm:$0xff]  }
 0x2f6   :  { %1248 = vmatprep.subr.bf16.mxu0 %v1336_v19  ;;  %988 = vmatprep.subr.bf16.mxu1 %v1339_v22 }
 0x2f9   :  { %1249 = vmatpush3.bf16.msra.mxu0 %v1336_v19  ;;  %989 = vmatpush1.bf16.msra.mxu1 %v1337_v24  ;;  %v1357_v19 = vld [vmem:[#allocation7] ss:$12 sps:$4 sm:$0xff]  }
 0x2fa   :  { %1250 = vmatprep.subr.bf16.mxu0 %v1340_v23  ;;  %990 = vmatprep.subr.bf16.mxu1 %v1343_v26 }
 0x2fd   :  { %1251 = vmatpush3.bf16.msra.mxu0 %v1340_v23  ;;  %991 = vmatpush1.bf16.msra.mxu1 %v1341_v28 }
 0x2fe   :  { %1252 = vmatprep.subr.bf16.mxu0 %v1344_v27  ;;  %992 = vmatprep.subr.bf16.mxu1 %v1347_v53 }
 0x301   :  { %1253 = vmatpush3.bf16.msra.mxu0 %v1344_v27  ;;  %993 = vmatpush1.bf16.msra.mxu1 %v1345_v52 }
 0x302   :  { %1254 = vmatprep.subr.bf16.mxu0 %v1348_v54  ;;  %994 = vmatprep.subr.bf16.mxu1 %v1351_v55 }
 0x305   :  { %1255 = vmatpush3.bf16.msra.mxu0 %v1348_v54  ;;  %995 = vmatpush1.bf16.msra.mxu1 %v1349_v56  ;;  %v1205_v56 = vld [vmem:[%s1806_s10] ss:$0 sm:$0xff] }
 0x306   :  { %1256 = vmatprep.subr.bf16.mxu0 %v1352_v59  ;;  %996 = vmatprep.subr.bf16.mxu1 %v1355_v5 }
 0x309   :  { %1257 = vmatpush3.bf16.msra.mxu0 %v1352_v59  ;;  %997 = vmatpush1.bf16.msra.mxu1 %v1353_v10  ;;  %v1093_v10 = vadd.f32 %v1205_v56, %v1552_v3 }
 0x30a   :  { %998 = vmatprep.subr.bf16.mxu1 %v1359_v17 }
 0x30d   :  { %999 = vmatpush1.bf16.msra.mxu1 %v1357_v19 }
 0x3b4   :  { %v726_v11 = vpop.f32.mrf.mxu0 }
 0x3b5   :  { %732 = vrot.lane.b32.xlu0 %v726_v11, %s1462_s23 }
 0x3b6   :  { %v728_v12 = vpop.f32.mrf.mxu0 }
 0x3b7   :  { %737 = vrot.lane.b32.xlu1 %v728_v12, %s1462_s23 }
 0x3b9   :  { %741 = vrot.lane.b32.xlu0 %v726_v11, %s1461_s21 }
 0x3bb   :  { %745 = vrot.lane.b32.xlu1 %v728_v12, %s1461_s21 }
 0x3bd   :  { %749 = vrot.lane.b32.xlu0 %v726_v11, %s1463_s24 }
 0x3bf   :  { %753 = vrot.lane.b32.xlu1 %v728_v12, %s1463_s24 }
 0x427   :  { %v733_v29 = vpop.permute.xlu0 %732 }
 0x428   :  { %v735_v33 = vadd.f32 %v733_v29, %v726_v11  ;;  %v1356_v11 = vld [vmem:[#allocation7 + $0x20] ss:$12 sps:$4 sm:$0xff]  }
 0x429   :  { %v738_v30 = vpop.permute.xlu1 %737  ;;  %1258 = vmatprep.subr.bf16.mxu0 %v1356_v11 }
 0x42a   :  { %v740_v36 = vadd.f32 %v738_v30, %v728_v12  ;;  %v655_v12 = vld [vmem:[%s1804_s8] sm:$0x1]  ;;  %1259 = vmatpush3.bf16.msra.mxu0 %v1356_v11 }
 0x42b   :  { %v742_v31 = vpop.permute.xlu0 %741  ;;  %1260 = vmatprep.subr.bf16.mxu0 %v1360_v9 }
 0x42c   :  { %v744_v37 = vadd.f32 %v742_v31, %v735_v33 }
 0x42d   :  { %v746_v34 = vpop.permute.xlu1 %745 }
 0x42e   :  { %v748_v39 = vadd.f32 %v746_v34, %v740_v36  ;;  %1261 = vmatpush3.bf16.msra.mxu0 %v1360_v9 }
 0x42f   :  { %v750_v38 = vpop.permute.xlu0 %749 }
 0x430   :  { %v752_v40 = vadd.f32 %v750_v38, %v744_v37 }
 0x431   :  { %v754_v41 = vpop.permute.xlu1 %753 }
 0x432   :  { %v757_v42 = vmul.f32 0.0078125, %v752_v40  ;;  %v756_v44 = vadd.f32 %v754_v41, %v748_v39 }
 0x434   :  { %v759_v45 = vmul.f32 %v757_v42, %v757_v42  ;;  %v758_v47 = vmul.f32 0.0078125, %v756_v44 }
 0x436   :  { %v760_v48 = vsub.f32 %v758_v47, %v759_v45 }
 0x438   :  { %v761_v49 = vmax.f32 %v760_v48, 0.0 }
 0x43a   :  { %v762_v50 = vadd.f32 1e-05, %v761_v49 }
 0x43c   :  { %1363 = vrsqrt.f32 %v762_v50 }
 0x449   :  { %v1364_v63 = vpop.eup %1363 }
 0x44a   :  { %v764_v62 = vmul.f32 %v1364_v63, %v654_v61 }
 0x44c   :  { %v771_v15 = vrot.slane %v764_v62, %v1585_v51  ;;  %v765_v16 = vmul.f32 %v764_v62, %v757_v42 }
 0x44e   :  { %775 = vrot.lane.b32.xlu1 %v771_v15, %s1461_s21  ;;  %772 = vrot.lane.b32.xlu0 %v771_v15, %s1463_s24  ;;  %v766_v18 = vsub.f32 %v655_v12, %v765_v16 }
 0x450   :  { %v788_v22 = vrot.slane %v766_v18, %v1585_v51 }
 0x452   :  { %778 = vrot.lane.b32.xlu0 %v771_v15, %s1462_s23  ;;  %789 = vrot.lane.b32.xlu1 %v788_v22, %s1463_s24 }
 0x456   :  { %792 = vrot.lane.b32.xlu0 %v788_v22, %s1461_s21  ;;  %795 = vrot.lane.b32.xlu1 %v788_v22, %s1462_s23 }
 0x4c0   :  { %v776_v23 = vpop.permute.xlu1 %775  ;;  %v773_v24 = vpop.permute.xlu0 %772 }
 0x4c1   :  { %v781_v26 = vsel %vm1812_vm15, %v764_v62, %v773_v24  ;;  %v1094_v24 = vadd.f32 %v1205_v56, %v1547_v2  ;;  %v1365_v2 = vld [vmem:[%s1796_s0 + $0x18] sm:$0xff]  ;;  %s1465_s0 = smov [#allocation8]  }
 0x4c2   :  { %v782_v27 = vsel %vm261_vm8, %v781_v26, %v776_v23  ;;  %s1141_s9 = sshll.u32 %s1465_s0, 4  ;;  %s1142_s9 = int_to_ptr.vmem [resolvable:$true] %s1141_s9 }
 0x4c3   :  { %s1426_s20 = scalar_lea.vmem %s1142_s9, 512  ;;  %p1431_p2 = scmp.lt.s32.totalorder %s1142_s9, %s1142_s9 }
 0x4c4   :  { %v779_v28 = vpop.permute.xlu0 %778  ;;  %v790_v29 = vpop.permute.xlu1 %789  ;;  %p1427_p1 = scmp.ne.s32.totalorder %s1142_s9, %s1426_s20  ;;  %p1432_p3 = scmp.lt.s32.totalorder %s1426_s20, %s1426_s20 }
 0x4c5   :  { %v783_v30 = vsel %vm263_vm9, %v782_v27, %v779_v28  ;;  %v798_v33 = vsel %vm1813_vm1, %v766_v18, %v790_v29 }
 0x4c6   :  { %v804_v31 = vrot.slane %v783_v30, %v1585_v51  ;;  %p1433_p4 = por %p1432_p3, %p1431_p2 }
 0x4c8   :  { %v793_v34 = vpop.permute.xlu0 %792  ;;  %v796_v36 = vpop.permute.xlu1 %795  ;;  %v805_v38 = vmul.f32 %v804_v31, %v1706_v8  ;;  %v806_v40 = vmul.f32 %v804_v31, %v1699_v1  ;;  %v807_v41 = vmul.f32 %v804_v31, %v1695_v58  ;;  %v808_v42 = vmul.f32 %v804_v31, %v1697_v60  ;;  %p1434_p5 = pnand %p1433_p4, %p1427_p1 }
 0x4c9   :  { %v799_v37 = vsel %vm261_vm8, %v798_v33, %v793_v34  ;;  %v1092_v34 = vadd.f32 %v1205_v56, %v1561_v6 }
 0x4ca   :  { %v800_v39 = vsel %vm263_vm9, %v799_v37, %v796_v36 }
 0x4cb   :  { %v812_v44 = vrot.slane %v800_v39, %v1585_v51 }
 0x4cd   :  { %v813_v45 = vadd.f32 %v812_v44, %v805_v38  ;;  %v814_v47 = vadd.f32 %v812_v44, %v806_v40  ;;  %v815_v48 = vadd.f32 %v812_v44, %v807_v41  ;;  %v816_v49 = vadd.f32 %v812_v44, %v808_v42 }
 0x4cf   :  { %v817_v50 = vmax.f32 %v813_v45, 0.0  ;;  %v818_v52 = vmax.f32 %v814_v47, 0.0  ;;  %v819_v53 = vmax.f32 %v815_v48, 0.0  ;;  %v820_v54 = vmax.f32 %v816_v49, 0.0 }
 0x4d1   :  { %v822_v55 = vpack.c.bf16 %v818_v52, %v817_v50  ;;  %v823_v8 = vpack.c.bf16 %v820_v54, %v819_v53 }
 0x4d3   :  { %1017 = vmatmul.mubr.bf16.vlgmr.msra.gmra.mxu1 %v822_v55  ;;  %1262 = vmatprep.mubr.bf16.mxu0 %v822_v55 }
 0x4d4   :  { %1263 = vmatmul.mubr.bf16.vlgmr.msra.gmra.mxu0 %v823_v8  ;;  %1026 = vmatprep.mubr.bf16.mxu1 %v1464_v4 }
 0x4db   :  { %1027 = vmatmul.mubr.bf16.gmra.mxu1 %v823_v8 }
 0x593   :  { %v1018_v58 = vpop.f32.mrf.mxu1 }
 0x594   :  { %v1264_v60 = vpop.f32.mrf.mxu0  ;;  %v1096_v61 = vrot.slane %v1018_v58, 7 }
 0x595   :  { %v1020_v1 = vpop.f32.mrf.mxu1  ;;  %v1118_v12 = vrot.slane %v1264_v60, 1 }
 0x596   :  { %v1071_v51 = vpop.f32.mrf.mxu0 }
 0x597   :  { %v1022_v59 = vpop.f32.mrf.mxu1  ;;  %v1116_v36 = vrot.slane %v1071_v51, 1 }
 0x598   :  { %v1097_v63 = vrot.slane %v1022_v59, 7  ;;  %v1265_v5 = vpop.f32.mrf.mxu0 }
 0x599   :  { %v1024_v62 = vpop.f32.mrf.mxu1  ;;  %v1119_v18 = vrot.slane %v1265_v5, 1 }
 0x59a   :  { %v1102_v11 = vsel %vm574_vm12, %v1096_v61, %v1097_v63  ;;  %v1074_v4 = vpop.f32.mrf.mxu0 }
 0x59b   :  { %v1105_v15 = vmul.f32 %v1290_v0, %v1102_v11  ;;  %v1117_v16 = vrot.slane %v1074_v4, 1  ;;  %v1028_v17 = vpop.f32.mrf.mxu1  ;;  %v1120_v29 = vsel %vm621_vm13, %v1118_v12, %v1119_v18  ;;  %v1123_v41 = vsel %vm621_vm13, %v1119_v18, %v1116_v36 }
 0x59c   :  { %v1098_v19 = vrot.slane %v1028_v17, 7  ;;  %v1126_v39 = vmul.f32 %v1296_v35, %v1120_v29  ;;  %v1127_v13 = vmul.f32 %v1291_v32, %v1123_v41 }
 0x59d   :  { %v1109_v9 = vadd.f32 %v1105_v15, %v1093_v10  ;;  %v1121_v22 = vsel %vm621_vm13, %v1117_v16, %v1118_v12  ;;  %v1030_v23 = vpop.f32.mrf.mxu1  ;;  %v1122_v42 = vsel %vm621_vm13, %v1116_v36, %v1117_v16 }
 0x59e   :  { %v1125_v3 = vmul.f32 %v1121_v22, %v1682_v43  ;;  %v1101_v26 = vsel %vm574_vm12, %v1097_v63, %v1098_v19  ;;  %v1095_v43 = vadd.f32 %v1365_v2, %v1205_v56  ;;  %v1124_v35 = vmul.f32 %v1122_v42, %v1693_v57 }
 0x59f   :  { %v1113_v27 = vadd.f32 %v1109_v9, %v1024_v62  ;;  %v1106_v0 = vmul.f32 %v1285_v14, %v1101_v26  ;;  %v1032_v28 = vpop.f32.mrf.mxu1 }
 0x5a0   :  { %v1099_v30 = vrot.slane %v1032_v28, 7 }
 0x5a1   :  { %v1129_v31 = vadd.f32 %v1125_v3, %v1113_v27  ;;  %v1110_v33 = vadd.f32 %v1106_v0, %v1094_v24  ;;  %v1034_v48 = vpop.f32.mrf.mxu1 }
 0x5a2   :  { %v1100_v37 = vsel %vm574_vm12, %v1098_v19, %v1099_v30  ;;  %v1103_v14 = vsel %vm574_vm12, %v1099_v30, %v1096_v61 }
 0x5a3   :  { %1133 = vst [vmem:[#allocation8 + $0x8] sm:$0xff] %v1129_v31  ;;  %v1114_v38 = vadd.f32 %v1110_v33, %v1030_v23  ;;  %v1104_v6 = vmul.f32 %v1295_v25, %v1103_v14  ;;  %v1107_v40 = vmul.f32 %v1284_v20, %v1100_v37 }
 0x5a5   :  { %v1130_v44 = vadd.f32 %v1126_v39, %v1114_v38  ;;  %v1108_v45 = vadd.f32 %v1104_v6, %v1092_v34  ;;  %v1111_v47 = vadd.f32 %v1107_v40, %v1095_v43 }
 0x5a7   :  { %1134 = vst [vmem:[#allocation8 + $0x10] sm:$0xff] %v1130_v44  ;;  %v1112_v21 = vadd.f32 %v1108_v45, %v1020_v1  ;;  %v1115_v25 = vadd.f32 %v1111_v47, %v1034_v48 }
 0x5a9   :  { %v1131_v20 = vadd.f32 %v1127_v13, %v1115_v25  ;;  %v1128_v49 = vadd.f32 %v1124_v35, %v1112_v21 }
 0x5ab   :  { %1135 = vst [vmem:[#allocation8 + $0x18] sm:$0xff] %v1131_v20  ;;  %1132 = vst [vmem:[#allocation8] sm:$0xff] %v1128_v49 }
 0x5ac   :  { %1437 = shalt.err (!%p1434_p5)
}
 0x5ad   :  { %1147 = dma.vmem_to_hbm [thread:$0]  %s1142_s9, 512, %s1807_s11, [#allocation4], %s1456_s27, %s1456_s27, %s1457_s28  }
 0x5ae   :  { %1450 = dma.done.wait [#allocation4], 512  }
 0x5af   :  { %1451 = vsyncadd [#allocation4], 4294966784 }
 0x5b0   :  { %1151 = vsyncpa [#allocation3], 1 }
 0x5b1   :  { %1152 = vsyncpa [#allocation6], 1 }
 0x5b2   :  { %1153 = vsyncpa [#allocation4], 1 }

</bundles_post_ra>
